<compile_context>
chip_gen: v5e
topology: v5e:2x2
jax: 0.10.0
libtpu: 0.0.40
codegen_flags: <defaults>
</compile_context>

<pallas_src>
import jax
import jax.numpy as jnp
from jax.experimental import pallas as pl
from jax.experimental.pallas import tpu as pltpu


def _yolo_decode_kernel(x_ref, meta_ref, grid_ref, out_ref):
    # x_ref   : VMEM (rb, sb)  raw predictions (input dtype); rows = fused
    #           (batch, anchor, attr), lanes = flattened gh*gw pixels
    # meta_ref: VMEM (rb, 5)   per-row [is_exp, anchor_wh, scale, sel_x, sel_y]
    # grid_ref: VMEM (2, sb)   row 0 = grid_x*stride, row 1 = grid_y*stride
    # out_ref : VMEM (rb, sb)  decoded predictions (f32, same layout as input)
    x = x_ref[...].astype(jnp.float32)              # upcast in-register (bf16 ok)

    # Compare on the narrow (rb, 1) column, then broadcast the mask ONCE
    # (used twice below; JAX does not CSE broadcast_in_dim).
    is_exp = jnp.broadcast_to(meta_ref[:, 0:1] > 0.5, x.shape)

    anc = meta_ref[:, 1:2]                          # (rb,1) anchor w/h on exp rows
    scale = meta_ref[:, 2:3]                        # (rb,1) stride on x/y rows else 1
    selx = meta_ref[:, 3:4]                         # (rb,1) 1.0 on the x row
    sely = meta_ref[:, 4:5]                         # (rb,1) 1.0 on the y row

    gxs = grid_ref[0:1, :]                          # (1,sb) grid_x * stride
    gys = grid_ref[1:2, :]                          # (1,sb) grid_y * stride
    off = selx * gxs + sely * gys                   # (rb,sb); zero off x/y rows

    # Exactly one transcendental per element: exp(+x) on w/h rows, exp(-x)
    # (the sigmoid denominator) everywhere else; the true select keeps inf
    # out of NaN paths.
    t = jnp.exp(jnp.where(is_exp, x, -x))
    sig = 1.0 / (1.0 + t)                           # exact divide: approx rcp
                                                    # would miss 1e-5 tolerance
    out_ref[...] = jnp.where(is_exp, t * anc, sig * scale + off)


_VMEM_BUDGET = 12 * 1024 * 1024   # stays under v5e's 16 MiB scoped-VMEM default
_MIN_BLOCK_BYTES = 256 * 1024     # amortizes the ~0.35 us per-grid-step overhead


def _pick_tiles(R, S, in_itemsize):
    """Pick a (rb, sb) block shape.

    sb: multiple of 128 (lane-dense, unmasked stores except a possible ragged
        last block handled by grid = cdiv), target ~512 lanes.
    rb: full R when the double-buffered in/out/meta blocks fit the VMEM
        budget, otherwise an 8-aligned band (<= 512 rows) so the footprint is
        bounded independently of nb*na*(5+num_classes).
    A final pass trades lane width for extra grid steps (>= 4 when blocks stay
    big enough), so v7x's two TensorCores each get >= 2 pipelined iterations.
    """
    if S <= 128:
        sb = S                                      # full-extent lane block
    else:
        sb = min(512, (S // 128) * 128)             # multiple of 128, <= 512

    def fits(rb_, sb_):
        main = rb_ * sb_ * (in_itemsize + 4)        # one input + one output block
        side = 8 * sb_ * 4 + rb_ * 128 * 4          # grid rows + lane-padded meta
        return 2 * (main + side) <= _VMEM_BUDGET    # double-buffered pipeline

    rb = R
    if not fits(rb, sb):
        rb = min(512, max(8, (R // 8) * 8))         # 8-aligned sublane band
        while rb > 8 and not fits(rb, sb):
            rb -= 8
    while sb > 128 and not fits(rb, sb):            # last resort: shrink lanes
        sb -= 128

    def n_steps(rb_, sb_):
        return pl.cdiv(R, rb_) * pl.cdiv(S, sb_)

    while (n_steps(rb, sb) < 4 and sb > 128
           and rb * (sb - 128) * (in_itemsize + 4) >= _MIN_BLOCK_BYTES):
        sb -= 128
    return rb, sb


def yolo_layer_pallas(x, anchors, num_classes, input_size, torch_layout=True):
    """Pallas implementation of YOLOLayer.forward.

    x: (nb, na*(5+num_classes), gh, gw), NCHW like PyTorch (f32 or bf16).
    Returns (nb, na*gh*gw, 5+num_classes) f32 if torch_layout (matches the
    PyTorch module), else (nb, na, 5+num_classes, gh*gw) f32 which skips one
    extra full-array HBM transpose pass.
    """
    anchors = jnp.asarray(anchors, jnp.float32)           # (na, 2)
    na = anchors.shape[0]
    A = 5 + num_classes
    nb, c, gh, gw = x.shape
    assert c == na * A, "channel dim must be na*(5+num_classes)"
    S = gh * gw
    R = nb * na * A
    stride = float(input_size[0]) / float(gh)

    # Free reshape (no data movement, no dtype cast): NCHW -> (nb*na*A, gh*gw).
    # Keeping the input dtype halves HBM read bytes when the head emits bf16;
    # the upcast happens in-register inside the kernel.
    xk = x.reshape(R, S)

    # Per-row metadata (R, 5): [is_exp, anchor_wh, scale, sel_x, sel_y].
    rows = jnp.arange(R, dtype=jnp.int32)
    r = rows % A                                          # attribute index
    a_idx = (rows // A) % na                              # anchor index
    aw = anchors[a_idx, 0]
    ah = anchors[a_idx, 1]
    is_exp = ((r == 2) | (r == 3)).astype(jnp.float32)
    anc = jnp.where(r == 2, aw, jnp.where(r == 3, ah, 1.0))
    scale = jnp.where(r < 2, jnp.float32(stride), jnp.float32(1.0))
    selx = (r == 0).astype(jnp.float32)
    sely = (r == 1).astype(jnp.float32)
    meta = jnp.stack([is_exp, anc, scale, selx, sely], axis=1)   # (R, 5)

    # Grid offsets pre-multiplied by stride: (2, S), row-major (h, w) flatten.
    gy, gx = jnp.meshgrid(jnp.arange(gh, dtype=jnp.float32),
                          jnp.arange(gw, dtype=jnp.float32), indexing="ij")
    grid_xy = jnp.stack([gx.reshape(S), gy.reshape(S)], axis=0) * stride  # (2, S)

    rb, sb = _pick_tiles(R, S, jnp.dtype(x.dtype).itemsize)
    r_steps = pl.cdiv(R, rb)
    s_steps = pl.cdiv(S, sb)

    out = pl.pallas_call(
        _yolo_decode_kernel,
        out_shape=jax.ShapeDtypeStruct((R, S), jnp.float32),
        grid_spec=pltpu.PrefetchScalarGridSpec(
            num_scalar_prefetch=0,
            grid=(r_steps, s_steps),
            in_specs=[
                pl.BlockSpec((rb, sb), lambda r, s: (r, s)),   # predictions
                pl.BlockSpec((rb, 5), lambda r, s: (r, 0)),    # per-row metadata
                pl.BlockSpec((2, sb), lambda r, s: (0, s)),    # grid offsets
            ],
            out_specs=pl.BlockSpec((rb, sb), lambda r, s: (r, s)),
        ),
        compiler_params=pltpu.CompilerParams(
            dimension_semantics=("parallel", "parallel")),
    )(xk, meta, grid_xy)

    if not torch_layout:
        # (nb, na, A, gh*gw): no extra HBM pass; attributes stay on the
        # sublane axis so a downstream consumer can slice rows directly.
        return out.reshape(nb, na, A, S)

    # Layout glue to the PyTorch output (nb, na*gh*gw, A): one extra XLA
    # transpose pass in HBM, kept OUT of the kernel so the kernel's stores
    # stay unmasked and lane-dense.  Pass torch_layout=False (or fuse the
    # permute into the consumer) to skip it for this bandwidth-bound decode.
    out = jnp.transpose(out.reshape(nb, na, A, S), (0, 1, 3, 2))
    return out.reshape(nb, na * S, A)


def yolo_layer_ref(x, anchors, num_classes, input_size):
    """Pure-JAX reference mirroring the PyTorch forward exactly."""
    anchors = jnp.asarray(anchors, jnp.float32)
    na = anchors.shape[0]
    A = 5 + num_classes
    nb, _, gh, gw = x.shape
    stride = float(input_size[0]) / float(gh)

    pred = x.reshape(nb, na, A, gh, gw).transpose(0, 1, 3, 4, 2)  # (nb,na,gh,gw,A)
    cx = jax.nn.sigmoid(pred[..., 0])
    cy = jax.nn.sigmoid(pred[..., 1])
    bw = pred[..., 2]
    bh = pred[..., 3]
    conf = jax.nn.sigmoid(pred[..., 4])
    cls = jax.nn.sigmoid(pred[..., 5:])

    grid_x = jnp.arange(gw, dtype=jnp.float32)[None, None, None, :]
    grid_y = jnp.arange(gh, dtype=jnp.float32)[None, None, :, None]
    aw = (anchors[:, 0] / stride)[None, :, None, None]
    ah = (anchors[:, 1] / stride)[None, :, None, None]

    boxes = jnp.stack(
        [cx + grid_x, cy + grid_y, jnp.exp(bw) * aw, jnp.exp(bh) * ah], axis=-1)
    return jnp.concatenate(
        [boxes.reshape(nb, -1, 4) * stride,
         conf.reshape(nb, -1, 1),
         cls.reshape(nb, -1, num_classes)], axis=-1)


if __name__ == "__main__":
    # Deterministic synthetic setup.  A realistic 13x13 YOLO head: S = 169 is
    # NOT a multiple of 128, so this exercises the ragged last lane block and
    # a multi-step grid (the exact case the old tile picker degenerated on).
    anchors = [(116.0, 90.0), (156.0, 198.0), (373.0, 326.0)]   # na = 3
    num_classes = 4                                              # bbox_attrs = 9
    input_size = (416, 416)                                      # stride = 416/13 = 32

    na = len(anchors)
    bbox_attrs = 5 + num_classes
    nb, gh, gw = 2, 13, 13

    key = jax.random.PRNGKey(0)
    x = jax.random.normal(key, (nb, na * bbox_attrs, gh, gw), dtype=jnp.float32)

    out = yolo_layer_pallas(x, anchors, num_classes, input_size)
    out = jax.block_until_ready(out)

    ref = yolo_layer_ref(x, anchors, num_classes, input_size)
    assert out.shape == (nb, na * gh * gw, bbox_attrs), out.shape
    assert jnp.allclose(out, ref, atol=1e-5, rtol=1e-5), "mismatch vs reference"

    print("KERNEL_OK")
</pallas_src>

<mosaic_0001>
module attributes {stable_mosaic.version = 11 : i64} {
  func.func @_yolo_decode_kernel(%arg0: i32, %arg1: i32, %arg2: memref<54x128xf32, #tpu.memory_space<vmem>>, %arg3: memref<54x5xf32, #tpu.memory_space<vmem>>, %arg4: memref<2x128xf32, #tpu.memory_space<vmem>>, %arg5: memref<54x128xf32, #tpu.memory_space<vmem>>) attributes {dimension_semantics = [#tpu.dimension_semantics<parallel>, #tpu.dimension_semantics<parallel>], iteration_bounds = array<i64: 1, 2>, scalar_prefetch = 0 : i64, scratch_operands = 0 : i64, tpu.core_type = #tpu.core_type<tc>, window_params = [{transform_indices = @transform_0, window_bounds = array<i64: 54, 128>}, {transform_indices = @transform_1, window_bounds = array<i64: 54, 5>}, {transform_indices = @transform_2, window_bounds = array<i64: 2, 128>}, {transform_indices = @transform_3, window_bounds = array<i64: 54, 128>}]} {
    %c0 = arith.constant 0 : index
    %c0_0 = arith.constant 0 : index
    %0 = vector.load %arg2[%c0, %c0_0] : memref<54x128xf32, #tpu.memory_space<vmem>>, vector<54x128xf32>
    %c0_1 = arith.constant 0 : index
    %c0_2 = arith.constant 0 : index
    %1 = vector.load %arg3[%c0_1, %c0_2] : memref<54x5xf32, #tpu.memory_space<vmem>>, vector<54x1xf32>
    %cst = arith.constant 5.000000e-01 : f32
    %2 = vector.broadcast %cst : f32 to vector<54x1xf32>
    %3 = arith.cmpf ogt, %1, %2 : vector<54x1xf32>
    %4 = vector.shape_cast %3 : vector<54x1xi1> to vector<54x1xi1>
    %5 = vector.broadcast %4 : vector<54x1xi1> to vector<54x128xi1>
    %c0_3 = arith.constant 0 : index
    %c1 = arith.constant 1 : index
    %6 = vector.load %arg3[%c0_3, %c1] : memref<54x5xf32, #tpu.memory_space<vmem>>, vector<54x1xf32>
    %c0_4 = arith.constant 0 : index
    %c2 = arith.constant 2 : index
    %7 = vector.load %arg3[%c0_4, %c2] : memref<54x5xf32, #tpu.memory_space<vmem>>, vector<54x1xf32>
    %c0_5 = arith.constant 0 : index
    %c3 = arith.constant 3 : index
    %8 = vector.load %arg3[%c0_5, %c3] : memref<54x5xf32, #tpu.memory_space<vmem>>, vector<54x1xf32>
    %c0_6 = arith.constant 0 : index
    %c4 = arith.constant 4 : index
    %9 = vector.load %arg3[%c0_6, %c4] : memref<54x5xf32, #tpu.memory_space<vmem>>, vector<54x1xf32>
    %c0_7 = arith.constant 0 : index
    %c0_8 = arith.constant 0 : index
    %10 = vector.load %arg4[%c0_7, %c0_8] : memref<2x128xf32, #tpu.memory_space<vmem>>, vector<1x128xf32>
    %c1_9 = arith.constant 1 : index
    %c0_10 = arith.constant 0 : index
    %11 = vector.load %arg4[%c1_9, %c0_10] : memref<2x128xf32, #tpu.memory_space<vmem>>, vector<1x128xf32>
    %12 = vector.broadcast %8 : vector<54x1xf32> to vector<54x128xf32>
    %13 = vector.broadcast %10 : vector<1x128xf32> to vector<54x128xf32>
    %14 = arith.mulf %12, %13 : vector<54x128xf32>
    %15 = vector.broadcast %9 : vector<54x1xf32> to vector<54x128xf32>
    %16 = vector.broadcast %11 : vector<1x128xf32> to vector<54x128xf32>
    %17 = arith.mulf %15, %16 : vector<54x128xf32>
    %18 = arith.addf %14, %17 : vector<54x128xf32>
    %cst_11 = arith.constant 0.000000e+00 : f32
    %19 = vector.broadcast %cst_11 : f32 to vector<54x128xf32>
    %20 = arith.subf %19, %0 : vector<54x128xf32>
    %21 = arith.select %5, %0, %20 : vector<54x128xi1>, vector<54x128xf32>
    %22 = math.exp %21 : vector<54x128xf32>
    %cst_12 = arith.constant 1.000000e+00 : f32
    %23 = vector.broadcast %cst_12 : f32 to vector<54x128xf32>
    %24 = arith.addf %23, %22 : vector<54x128xf32>
    %cst_13 = arith.constant 1.000000e+00 : f32
    %25 = vector.broadcast %cst_13 : f32 to vector<54x128xf32>
    %26 = arith.divf %25, %24 : vector<54x128xf32>
    %27 = vector.broadcast %6 : vector<54x1xf32> to vector<54x128xf32>
    %28 = arith.mulf %22, %27 : vector<54x128xf32>
    %29 = vector.broadcast %7 : vector<54x1xf32> to vector<54x128xf32>
    %30 = arith.mulf %26, %29 : vector<54x128xf32>
    %31 = arith.addf %30, %18 : vector<54x128xf32>
    %32 = arith.select %5, %28, %31 : vector<54x128xi1>, vector<54x128xf32>
    %c0_14 = arith.constant 0 : index
    %c0_15 = arith.constant 0 : index
    %33 = vector.load %arg5[%c0_14, %c0_15] : memref<54x128xf32, #tpu.memory_space<vmem>>, vector<54x128xf32>
    tpu.vector_store %arg5[%c0_14, %c0_15], %32 {strides = array<i32>} : memref<54x128xf32, #tpu.memory_space<vmem>>, vector<54x128xf32>,
    return
  }
  func.func @transform_0(%arg0: i32, %arg1: i32) -> (i32, i32) {
    %c0_i32 = arith.constant 0 : i32
    return %arg0, %arg1 : i32, i32
  }
  func.func @transform_1(%arg0: i32, %arg1: i32) -> (i32, i32) {
    %c0_i32 = arith.constant 0 : i32
    %c0_i32_0 = arith.constant 0 : i32
    return %arg0, %c0_i32 : i32, i32
  }
  func.func @transform_2(%arg0: i32, %arg1: i32) -> (i32, i32) {
    %c0_i32 = arith.constant 0 : i32
    %c0_i32_0 = arith.constant 0 : i32
    return %c0_i32, %arg1 : i32, i32
  }
  func.func @transform_3(%arg0: i32, %arg1: i32) -> (i32, i32) {
    %c0_i32 = arith.constant 0 : i32
    return %arg0, %arg1 : i32, i32
  }
}

</mosaic_0001>

<bundles_post_ra>
// kernel: tpu_custom_call.1
= control target key start
LH: loop header
LB: loop body
LE: loop exit
PB: predicated region body
PF: predicated region fallthrough
CT: control target
= control target key end

     0   :  { %8 = vsyncpa [#allocation3], 0  ;;  %s1498_s0 = inlined_call_operand.hbm [shape: f32[54,169], index: 0, kind: input, shape index: {}]   ;;  %s1499_s1 = inlined_call_operand.vmem [shape: f32[54,5], index: 1, kind: input, shape index: {}]   ;;  %s1500_s2 = inlined_call_operand.vmem [shape: f32[2,169], index: 2, kind: input, shape index: {}]   ;;  %s1501_s3 = inlined_call_operand.hbm [shape: f32[54,169], index: 3, kind: output, shape index: {}]  }
   0x1   :  { %10 = vsyncpa [#allocation3 + $0x1], 0 }
   0x2   :  { %11 = vsyncpa [#allocation4], 0 }
   0x3   :  { %13 = vsyncpa [#allocation4 + $0x1], 0  ;;  %s1031_s12 = smov 0   ;;  %s1033_s13 = smov 0  }
   0x4   :  { %s1035_s14 = smov 0   ;;  %s1037_s15 = smov 0  }
   0x5   :  { %s1039_s16 = smov 0   ;;  %s1041_s17 = smov 0  }
   0x6 LB: > { %s755_s18 = sadd.s32 4294967295, %s998_s17   ;;  %s756_s19 = sadd.s32 4294967294, %s998_s17   ;;  %s998_s17 = sphi %s1041_s17, %s19_s17   ;;  %s994_s16 = sphi %s1039_s16, %s1520_s16   ;;  %s990_s15 = sphi %s1037_s15, %s1519_s15   ;;  %s986_s14 = sphi %s1035_s14, %s1518_s14   ;;  %s982_s13 = sphi %s1033_s13, %s1517_s13   ;;  %s978_s12 = sphi %s1031_s12, %s1516_s12  }
   0x7   : > { %s28_s20 = sadd.s32 1, %s994_s16  ;;  %s40_s21 = sadd.s32 1, %s986_s14 }
   0x8   : > { %p29_p0 = scmp.ge.s32.totalorder %s28_s20, 2  ;;  %p47_p1 = scmp.ne.s32.totalorder %s986_s14, %s982_s13 }
   0x9   : > { %p48_p2 = scmp.eq.s32.totalorder %s998_s17, 0  ;;  %p53_p3 = scmp.ne.s32.totalorder %s982_s13, %s978_s12 }
   0xa   : > { %s1522_s20 = smov (%p29_p0, %s28_s20), 0  ;;  %p54_p5 = scmp.eq.s32.totalorder %s755_s18, 0 }
   0xb   : > { %p1072_p4 = por %p48_p2, %p47_p1  ;;  %s36_s23 = ssub.s32 %s994_s16, %s1522_s20 }
   0xc   : > { %p131_p6 = scmp.eq.s32.totalorder %s755_s18, 1  ;;  %p38_p7 = scmp.eq.s32.totalorder %s36_s23, 0 }
   0xd   : > { %p1078_p8 = por %p54_p5, %p53_p3  ;;  %p137_p10 = scmp.eq.s32.totalorder %s756_s19, 1 }
   0xe   : > { %p1082_p9 = por %p131_p6, %p47_p1  ;;  %p759_p12 = scmp.ge.s32.totalorder %s998_s17, 2 }
   0xf   : > { %s1087_s26 = scalar_select %p38_p7, %s986_s14, %s40_s21  }
  0x10   : > { %p1089_p11 = por %p137_p10, %p53_p3  ;;  %p780_p13 = scmp.lt.s32.totalorder %s998_s17, 2 }
  0x11   : > { %s166_s28 = sand.u32 1, %s986_s14   ;;  %s760_s30 = sshll.u32 %s994_s16, 3 }
  0x12   : > { %s766_s29 = smul.u32 56, %s166_s28  ;;  %p773_p0 = pnand %p780_p13, %p1072_p4 }
  0x13   : > { %s177_s6 = scalar_lea.hbm %s1498_s0, %s760_s30  ;;  %s167_s10 = scalar_lea.sflag [#allocation3], %s166_s28 }
  0x14   : > { %s178_s7 = sshll.u32 %s177_s6, 4  ;;  %s170_s8 = scalar_lea.vmem [#allocation2], %s766_s29  ;;  %s179_s7 = int_to_ptr.hbm [resolvable:$true] %s178_s7 }
  0x15   : > { %s180_s9 = sshll.u32 %s170_s8, 4  ;;  %s1000_s11 = smov 256   ;;  %s181_s9 = int_to_ptr.vmem [resolvable:$true] %s180_s9 }
  0x16   : > { %s1001_s18 = smov 128   ;;  %s1002_s19 = smov 8  }
  0x17   : > { %775 = dma.hbm_to_vmem [thread:$0]  (!%p773_p0), %s179_s7, 896, %s181_s9, %s167_s10, %s1000_s11, %s1001_s18, %s1002_s19  }
  0x18   : > { %p761_p1 = scmp.ge.s32.totalorder %s998_s17, 1  ;;  %p195_p2 = scmp.lt.s32.totalorder %s998_s17, 3 }
  0x1a   : > { %p196_p3 = pnand %p761_p1, %p195_p2 }
  0x1b   : > { %s1105_s21 = sand.u32 (!%p196_p3), 1, %s982_s13  }
  0x1c   : > { %199 = sbr.rel (%p196_p3) target bundleno = 263 (0x107), region = 32  ;;  %s202_s23 = scalar_lea.sflag (!%p196_p3), [#allocation3], %s1105_s21 }
  0x1d   : > { %s767_s22 = smul.u32 (!%p196_p3), 56, %s1105_s21 }
  0x1f   : > { %s1111_s29 = scalar_lea.vmem (!%p196_p3), [#allocation2], %s767_s22 }
  0x21   : > { %969 = dma.done.wait (%p1078_p8), %s202_s23, 896  }
  0x22   : > { %971 = vsyncadd (%p1078_p8), %s202_s23, 4294966400  ;;  %p245_p4 = scmp.lt.s32.totalorder %s990_s15, 1  ;;  %v1003_v0 = vmov 0   ;;  %v1122_v1 = vld [vmem:[%s1499_s1 + $0x20] sm:$0xff]  ;;  %v259_v2 = vld [vmem:[%s1499_s1 + $0x10] sm:$0xff]  ;;  %v1004_v15 = vmov 3  }
  0x23   : > { %843 = vset.pattern.permute.xlu2 %v1003_v0  ;;  %842 = vset.pattern.permute.xlu1 %v1003_v0  ;;  %v1130_v3 = vld [vmem:[%s1499_s1] sm:$0xff]  ;;  %vm268_vm0 = vcmp.gt.f32.partialorder %v1122_v1, 0.5  ;;  %vm266_vm1 = vcmp.gt.f32.partialorder %v259_v2, 0.5  ;;  %v1137_v7 = vld [vmem:[%s1499_s1 + $0x28] sm:$0xff]  ;;  %v260_v8 = vld [vmem:[%s1499_s1 + $0x18] sm:$0xff]  ;;  %v1005_v16 = vmov 4  }
  0x24   : > { %841 = vset.pattern.permute.xlu0 %v1003_v0  ;;  %s246_s28 = scalar_select %p245_p4, %s990_s15, 1  ;;  %vm264_vm2 = vcmp.gt.f32.partialorder %v1130_v3, 0.5  ;;  %v275_v4 = vsel %vm268_vm0, 1, %v1003_v0  ;;  %v273_v5 = vsel %vm266_vm1, 1, %v1003_v0  ;;  %v258_v9 = vld [vmem:[%s1499_s1 + $0x8] sm:$0xff]  ;;  %vm269_vm3 = vcmp.gt.f32.partialorder %v1137_v7, 0.5 }
  0x25   : > { %v271_v6 = vsel %vm264_vm2, 1, %v1003_v0  ;;  %291 = vperm.xlu2 %843, %v275_v4   ;;  %285 = vperm.xlu1 %842, %v273_v5   ;;  %vm267_vm4 = vcmp.gt.f32.partialorder %v260_v8, 0.5  ;;  %vm265_vm5 = vcmp.gt.f32.partialorder %v258_v9, 0.5  ;;  %v276_v10 = vsel %vm269_vm3, 1, %v1003_v0  ;;  %v263_v13 = vld [vmem:[%s1499_s1 + $0x30] sm:$0x3f] }
  0x26   : > { %s762_s30 = sshll.u32 %s246_s28, 1  ;;  %279 = vperm.xlu0 %841, %v271_v6   ;;  %v274_v11 = vsel %vm267_vm4, 1, %v1003_v0  ;;  %v272_v12 = vsel %vm265_vm5, 1, %v1003_v0  ;;  %vm270_vm6 = vcmp.gt.f32.partialorder %v263_v13, 0.5  ;;  %v1006_v17 = vmov 1   ;;  %v251_v25 = vld [vmem:[%s1111_s29 + $0x8] sm:$0xff] }
  0x27   : > { %s1145_s28 = scalar_lea.vmem %s1500_s2, %s762_s30  ;;  %v277_v14 = vsel %vm270_vm6, 1, %v1003_v0  ;;  %v1007_v18 = vmov 2   ;;  %v395_v27 = vsub.f32 0.0, %v251_v25  ;;  %v254_v30 = vld [vmem:[%s1111_s29 + $0x20] sm:$0xff]  ;;  %v252_v32 = vld [vmem:[%s1111_s29 + $0x10] sm:$0xff]  ;;  %v253_v63 = vld [vmem:[%s1111_s29 + $0x18] sm:$0xff] }
  0x28   : > { %v398_v33 = vsub.f32 0.0, %v254_v30  ;;  %v396_v35 = vsub.f32 0.0, %v252_v32  ;;  %v256_v41 = vld [vmem:[%s1111_s29 + $0x30] sm:$0x3f]  ;;  %v250_v51 = vld [vmem:[%s1111_s29] sm:$0xff]  ;;  %v255_v6 = vld [vmem:[%s1111_s29 + $0x28] sm:$0xff] }
  0x29   : > { %v400_v44 = vsub.f32 0.0, %v256_v41  ;;  %v394_v54 = vsub.f32 0.0, %v250_v51  ;;  %s1359_s29 = scalar_lea.vmem [#allocation5], %s767_s22  ;;  %s763_s22 = sshll.u32 %s990_s15, 3 }
  0x2a   : > { %s639_s15 = scalar_lea.hbm %s1501_s3, %s763_s22  ;;  %s640_s8 = sshll.u32 %s1359_s29, 4  ;;  %s641_s8 = int_to_ptr.vmem [resolvable:$true] %s640_s8 }
  0x2b   : > { %s642_s9 = sshll.u32 %s639_s15, 4  ;;  %s626_s10 = scalar_lea.sflag [#allocation4], %s1105_s21  ;;  %s643_s9 = int_to_ptr.hbm [resolvable:$true] %s642_s9 }
  0x2c   : > { %s930_s11 = sshra.s32 %s643_s9, 4  ;;  %s931_s11 = int_to_ptr.hbm [resolvable:$true] %s930_s11 }
  0x2d   : > { %294 = vperm.xlu2 %843, %v276_v10   ;;  %288 = vperm.xlu1 %842, %v274_v11   ;;  %s932_s18 = scalar_lea.hbm %s931_s11, 56  ;;  %p937_p8 = scmp.lt.s32.totalorder %s931_s11, %s1501_s3 }
  0x2e   : > { %282 = vperm.xlu0 %841, %v272_v12   ;;  %p933_p5 = scmp.ne.s32.totalorder %s931_s11, %s932_s18 }
  0x30   : > { %p934_p6 = pnand %p933_p5, %p1082_p9 }
  0x32   : > { %p935_p7 = pneg %p934_p6 }
  0x35   : > { %845 = vset.pattern.permute.xlu2 %v1004_v15  ;;  %844 = vset.pattern.permute.xlu1 %v1004_v15 }
  0x36   : > { %297 = vperm.xlu0 %841, %v277_v14   ;;  %315 = vperm.xlu2 %845, %v258_v9  }
  0x37   : > { %310 = vperm.xlu1 %844, %v1130_v3  }
  0x3e   : > { %846 = vset.pattern.permute.xlu0 %v1004_v15  ;;  %330 = vperm.xlu2 %845, %v1122_v1  }
  0x3f   : > { %325 = vperm.xlu1 %844, %v260_v8   ;;  %320 = vperm.xlu0 %846, %v259_v2  }
  0x46   : > { %340 = vperm.xlu2 %845, %v263_v13  }
  0x47   : > { %335 = vperm.xlu1 %844, %v1137_v7   ;;  %847 = vset.pattern.permute.xlu0 %v1005_v16 }
  0x48   : > { %352 = vperm.xlu0 %847, %v1130_v3  }
  0x4e   : > { %849 = vset.pattern.permute.xlu2 %v1005_v16 }
  0x4f   : > { %848 = vset.pattern.permute.xlu1 %v1005_v16  ;;  %360 = vperm.xlu2 %849, %v259_v2  }
  0x50   : > { %356 = vperm.xlu1 %848, %v258_v9   ;;  %372 = vperm.xlu0 %847, %v1137_v7  }
  0x57   : > { %368 = vperm.xlu2 %849, %v1122_v1  }
  0x58   : > { %364 = vperm.xlu1 %848, %v260_v8   ;;  %851 = vset.pattern.permute.xlu0 %v1006_v17 }
  0x59   : > { %539 = vperm.xlu0 %851, %v258_v9  }
  0x5f   : > { %850 = vset.pattern.permute.xlu2 %v1006_v17 }
  0x60   : > { %376 = vperm.xlu1 %848, %v263_v13   ;;  %535 = vperm.xlu2 %850, %v1130_v3  }
  0x61   : > { %559 = vperm.xlu0 %851, %v263_v13  }
  0x68   : > { %852 = vset.pattern.permute.xlu1 %v1006_v17  ;;  %547 = vperm.xlu2 %850, %v260_v8  }
  0x69   : > { %543 = vperm.xlu1 %852, %v259_v2   ;;  %855 = vset.pattern.permute.xlu0 %v1007_v18 }
  0x6a   : > { %578 = vperm.xlu0 %855, %v259_v2   ;;  %v397_v2 = vsub.f32 0.0, %v253_v63 }
  0x70   : > { %555 = vperm.xlu2 %850, %v1137_v7  }
  0x71   : > { %551 = vperm.xlu1 %852, %v1122_v1  }
  0x78   : > { %854 = vset.pattern.permute.xlu2 %v1007_v18 }
  0x79   : > { %853 = vset.pattern.permute.xlu1 %v1007_v18  ;;  %574 = vperm.xlu2 %854, %v258_v9  }
  0x7a   : > { %570 = vperm.xlu1 %853, %v1130_v3  }
  0x7f   : > { %v1164_v19 = vpop.permute.xlu2 %291 }
  0x80   : > { %vm303_vm8 = vcmp.eq.s32.totalorder %v1164_v19, 1 }
  0x81   : > { %586 = vperm.xlu2 %854, %v1122_v1   ;;  %v405_v39 = vsel %vm303_vm8, %v254_v30, %v398_v33 }
  0x82   : > { %582 = vperm.xlu1 %853, %v260_v8   ;;  %v416_v42 = vmul.f32 1.442695, %v405_v39 }
  0x87   : > { %v1167_v20 = vpop.permute.xlu2 %294 }
  0x88   : > { %vm304_vm13 = vcmp.eq.s32.totalorder %v1167_v20, 1 }
  0x89   : > { %594 = vperm.xlu2 %854, %v263_v13   ;;  %v399_v13 = vsub.f32 0.0, %v255_v6 }
  0x8a   : > { %590 = vperm.xlu1 %853, %v1137_v7  }
  0x90   : > { %v1170_v21 = vpop.permute.xlu2 %315 }
  0x97   : > { %v1172_v22 = vpop.permute.xlu1 %285 }
  0x98   : > { %v1174_v23 = vpop.permute.xlu2 %330  ;;  %v1176_v24 = vpop.permute.xlu0 %279  ;;  %vm301_vm9 = vcmp.eq.s32.totalorder %v1172_v22, 1 }
  0x99   : > { %v403_v40 = vsel %vm301_vm9, %v252_v32, %v396_v35  ;;  %vm299_vm11 = vcmp.eq.s32.totalorder %v1176_v24, 1 }
  0x9a   : > { %v412_v43 = vmul.f32 1.442695, %v403_v40  ;;  %v401_v60 = vsel %vm299_vm11, %v250_v51, %v394_v54 }
  0x9b   : > { %v408_v0 = vmul.f32 1.442695, %v401_v60 }
  0x9f   : > { %v1179_v26 = vpop.permute.xlu1 %288 }
  0xa0   : > { %v1181_v28 = vpop.permute.xlu2 %340  ;;  %v1183_v29 = vpop.permute.xlu0 %282  ;;  %vm302_vm12 = vcmp.eq.s32.totalorder %v1179_v26, 1 }
  0xa1   : > { %vm300_vm7 = vcmp.eq.s32.totalorder %v1183_v29, 1  ;;  %v404_v10 = vsel %vm302_vm12, %v253_v63, %v397_v2 }
  0xa2   : > { %v402_v31 = vsel %vm300_vm7, %v251_v25, %v395_v27  ;;  %v414_v14 = vmul.f32 1.442695, %v404_v10  ;;  %v406_v25 = vsel %vm304_vm13, %v255_v6, %v399_v13 }
  0xa3   : > { %v410_v34 = vmul.f32 1.442695, %v402_v31 }
  0xa5   : > { %858 = vpow2.f32 %v410_v34 }
  0xa6   : > { %860 = vpow2.f32 %v416_v42 }
  0xa7   : > { %862 = vpow2.f32 %v412_v43 }
  0xa8   : > { %v1191_v36 = vpop.permute.xlu0 %297 }
  0xa9   : > { %v1194_v37 = vpop.permute.xlu1 %310  ;;  %v1196_v38 = vpop.permute.xlu2 %360  ;;  %vm305_vm10 = vcmp.eq.s32.totalorder %v1191_v36, 1 }
  0xaa   : > { %v407_v50 = vsel %vm305_vm10, %v256_v41, %v400_v44  ;;  %v418_v41 = vmul.f32 1.442695, %v406_v25  ;;  %v1292_v44 = vld [vmem:[%s1145_s28] ss:$0 sm:$0xff] }
  0xab   : > { %v1203_v45 = vpop.eup %858  ;;  %v420_v52 = vmul.f32 1.442695, %v407_v50  ;;  %v1295_v50 = vld [vmem:[%s1145_s28 + $0x1] ss:$0 sm:$0xff]  ;;  %s936_s28 = scalar_lea.hbm %s1501_s3, 112 }
  0xac   : > { %v1213_v49 = vadd.f32 1.0, %v1203_v45  ;;  %v1218_v53 = vpop.eup %860  ;;  %p938_p10 = scmp.lt.s32.totalorder %s936_s28, %s932_s18 }
  0xad   : > { %v1222_v55 = vpop.eup %862  ;;  %v1227_v57 = vadd.f32 1.0, %v1218_v53 }
  0xae   : > { %864 = vrcp.f32 %v1213_v49  ;;  %v1236_v61 = vadd.f32 1.0, %v1222_v55  ;;  %vm449_vm14 = vweird.f32 %v1213_v49  ;;  %v455_v33 = vand.u32 2147483648, %v1213_v49  ;;  %p939_p13 = por %p938_p10, %p937_p8 }
  0xaf   : > { %866 = vpow2.f32 %v420_v52  ;;  %v453_v39 = vand.u32 2147483647, %v1213_v49  ;;  %vm494_vm2 = vweird.f32 %v1227_v57 }
  0xb0   : > { %868 = vrcp.f32 %v1227_v57  ;;  %v456_v51 = vor.u32 1.1754944e-38, %v455_v33  ;;  %p940_p0 = pnand %p939_p13, %p935_p7 }
  0xb1   : > { %v1206_v46 = vpop.permute.xlu1 %325  ;;  %v1208_v47 = vpop.permute.xlu2 %368  ;;  %870 = vrcp.f32 %v1236_v61  ;;  %vm454_vm1 = vcmp.eq.f32.partialorder %v453_v39, 8.507059e+37 }
  0xb2   : > { %v1210_v48 = vpop.permute.xlu0 %320  ;;  %872 = vpow2.f32 %v408_v0  ;;  %v498_v0 = vand.u32 2147483647, %v1227_v57 }
  0xb4   : > { %v1238_v62 = vpop.eup %864  ;;  %vm1326_vm5 = vcmp.eq.f32.partialorder %v498_v0, 8.507059e+37 }
  0xb5   : > { %v1242_v1 = vpop.eup %866  ;;  %v445_v3 = vmul.f32 %v1238_v62, %v1213_v49  ;;  %vm450_vm15 = vweird.f32 %v1238_v62 }
  0xb6   : > { %v1252_v7 = vadd.f32 1.0, %v1242_v1  ;;  %v1256_v9 = vpop.eup %868  ;;  %vm1287_vm0 = vmor %vm449_vm14, %vm450_vm15  ;;  %vm464_vm14 = vweird.f32 %v1236_v61 }
  0xb7   : > { %v446_v11 = vsub.f32 1.0, %v445_v3  ;;  %v1260_v12 = vpop.eup %870  ;;  %v490_v15 = vmul.f32 %v1256_v9, %v1227_v57  ;;  %v345_v3 = vmul.f32 %v1292_v44, %v1170_v21  ;;  %vm495_vm3 = vweird.f32 %v1256_v9 }
  0xb8   : > { %874 = vrcp.f32 %v1252_v7  ;;  %v1266_v16 = vpop.eup %872  ;;  %v460_v18 = vmul.f32 %v1260_v12, %v1236_v61  ;;  %vm1322_vm4 = vmor %vm494_vm2, %vm495_vm3  ;;  %vm465_vm6 = vweird.f32 %v1260_v12 }
  0xb9   : > { %v1224_v56 = vpop.permute.xlu1 %335  ;;  %v447_v17 = vmul.f32 %v1238_v62, %v446_v11  ;;  %v1278_v30 = vadd.f32 1.0, %v1266_v16  ;;  %876 = vpow2.f32 %v414_v14  ;;  %v491_v34 = vsub.f32 1.0, %v490_v15  ;;  %vm1348_vm15 = vmor %vm464_vm14, %vm465_vm6 }
  0xba   : > { %v1229_v58 = vpop.permute.xlu0 %352  ;;  %v1231_v59 = vpop.permute.xlu2 %535  ;;  %v461_v43 = vsub.f32 1.0, %v460_v18 }
  0xbb   : > { %v448_v35 = vadd.f32 %v1238_v62, %v447_v17  ;;  %878 = vrcp.f32 %v1278_v30  ;;  %v492_v52 = vmul.f32 %v1256_v9, %v491_v34 }
  0xbc   : > { %880 = vpow2.f32 %v418_v41  ;;  %v462_v2 = vmul.f32 %v1260_v12, %v461_v43  ;;  %v470_v41 = vand.u32 2147483648, %v1236_v61  ;;  %v348_v43 = vmul.f32 %v1292_v44, %v1174_v23 }
  0xbd   : > { %v452_v49 = vsel %vm1287_vm0, %v1238_v62, %v448_v35  ;;  %v500_v62 = vand.u32 2147483648, %v1227_v57  ;;  %v493_v13 = vadd.f32 %v1256_v9, %v492_v52  ;;  %v468_v52 = vand.u32 2147483647, %v1236_v61 }
  0xbe   : > { %v1285_v40 = vpop.eup %874  ;;  %v457_v11 = vsel %vm454_vm1, %v456_v51, %v452_v49  ;;  %v463_v33 = vadd.f32 %v1260_v12, %v462_v2  ;;  %v384_v51 = vmul.f32 %v1295_v50, %v1208_v47  ;;  %v382_v47 = vmul.f32 %v1295_v50, %v1196_v38 }
  0xbf   : > { %v520_v60 = vmul.f32 %v1285_v40, %v1252_v7  ;;  %v1305_v63 = vpop.eup %876  ;;  %v501_v39 = vor.u32 1.1754944e-38, %v500_v62  ;;  %v346_v61 = vmul.f32 %v1292_v44, %v1210_v48  ;;  %vm525_vm0 = vweird.f32 %v1285_v40 }
  0xc0   : > { %v1318_v14 = vadd.f32 1.0, %v1305_v63  ;;  %v467_v29 = vsel %vm1348_vm15, %v1260_v12, %v463_v33  ;;  %v391_v38 = vadd.f32 %v384_v51, %v348_v43  ;;  %vm469_vm1 = vcmp.eq.f32.partialorder %v468_v52, 8.507059e+37 }
  0xc1   : > { %v521_v18 = vsub.f32 1.0, %v520_v60  ;;  %v1320_v21 = vpop.eup %878  ;;  %v471_v60 = vor.u32 1.1754944e-38, %v470_v41  ;;  %v530_v12 = vand.u32 2147483648, %v1252_v7 }
  0xc2   : > { %v357_v4 = vpop.permute.xlu1 %356  ;;  %v1248_v5 = vpop.permute.xlu0 %372  ;;  %882 = vrcp.f32 %v1318_v14 }
  0xc3   : > { %v1254_v8 = vpop.permute.xlu2 %547  ;;  %v381_v54 = vmul.f32 %v1295_v50, %v357_v4  ;;  %v1334_v42 = vpop.eup %880  ;;  %v522_v23 = vmul.f32 %v1285_v40, %v521_v18 }
  0xc4   : > { %v1368_v49 = vadd.f32 1.0, %v1334_v42 }
  0xc5   : > { %v388_v15 = vadd.f32 %v381_v54, %v345_v3 }
  0xc6   : > { %884 = vrcp.f32 %v1368_v49  ;;  %v515_v24 = vand.u32 2147483648, %v1368_v49 }
  0xc8   : > { %v1383_v57 = vpop.eup %882 }
  0xc9   : > { %v475_v52 = vmul.f32 %v1383_v57, %v1318_v14 }
  0xca   : > { %v1273_v27 = vpop.permute.xlu1 %364 }
  0xcb   : > { %v1280_v31 = vpop.permute.xlu2 %555  ;;  %v540_v32 = vpop.permute.xlu0 %539 }
  0xcc   : > { %v563_v34 = vmul.f32 %v1203_v45, %v540_v32  ;;  %v497_v32 = vsel %vm1322_vm4, %v1256_v9, %v493_v13  ;;  %v430_v9 = vmul.f32 %v1320_v21, %v1278_v30  ;;  %v528_v13 = vand.u32 2147483647, %v1252_v7 }
  0xcd   : > { %v502_v2 = vsel %vm1326_vm5, %v501_v39, %v497_v32  ;;  %v531_v39 = vor.u32 1.1754944e-38, %v530_v12  ;;  %vm434_vm4 = vweird.f32 %v1278_v30  ;;  %vm435_vm5 = vweird.f32 %v1320_v21 }
  0xce   : > { %v431_v25 = vsub.f32 1.0, %v430_v9  ;;  %vm529_vm3 = vcmp.eq.f32.partialorder %v528_v13, 8.507059e+37  ;;  %v383_v13 = vmul.f32 %v1295_v50, %v1273_v27 }
  0xd0   : > { %v432_v51 = vmul.f32 %v1320_v21, %v431_v25 }
  0xd2   : > { %v377_v6 = vpop.permute.xlu1 %376 }
  0xd3   : > { %v1314_v4 = vpop.permute.xlu0 %559  ;;  %v575_v10 = vpop.permute.xlu2 %574  ;;  %v386_v41 = vmul.f32 %v1295_v50, %v377_v6 }
  0xd4   : > { %v598_v17 = vmul.f32 %v575_v10, %v457_v11  ;;  %v472_v10 = vsel %vm469_vm1, %v471_v60, %v467_v29  ;;  %v523_v11 = vadd.f32 %v1285_v40, %v522_v23  ;;  %v440_v23 = vand.u32 2147483648, %v1278_v30 }
  0xd5   : > { %v476_v29 = vsub.f32 1.0, %v475_v52  ;;  %v568_v9 = vmul.f32 %v1242_v1, %v1314_v4  ;;  %v344_v1 = vmul.f32 %v1292_v44, %v1194_v37  ;;  %v483_v37 = vand.u32 2147483647, %v1318_v14 }
  0xd6   : > { %v605_v35 = vadd.f32 %v598_v17, %v388_v15  ;;  %v389_v15 = vadd.f32 %v382_v47, %v346_v61  ;;  %v1403_v47 = vpop.eup %884  ;;  %v438_v61 = vand.u32 2147483647, %v1278_v30  ;;  %v380_v30 = vmul.f32 %v1295_v50, %v1229_v58 }
  0xd7   : > { %v477_v19 = vmul.f32 %v1383_v57, %v476_v29  ;;  %v485_v58 = vand.u32 2147483648, %v1318_v14  ;;  %vm484_vm15 = vcmp.eq.f32.partialorder %v483_v37, 8.507059e+37 }
  0xd8   : > { %v612_v45 = vsel %vm300_vm7, %v563_v34, %v605_v35  ;;  %vm524_vm7 = vweird.f32 %v1252_v7  ;;  %vm439_vm6 = vcmp.eq.f32.partialorder %v438_v61, 8.507059e+37 }
  0xd9   : > { %619 = vst [vmem:[%s1359_s29 + $0x8] sm:$0xff] %v612_v45  ;;  %vm1379_vm2 = vmor %vm524_vm7, %vm525_vm0  ;;  %v486_v25 = vor.u32 1.1754944e-38, %v485_v58  ;;  %vm509_vm7 = vweird.f32 %v1368_v49  ;;  %vm510_vm0 = vweird.f32 %v1403_v47 }
  0xda   : > { %v527_v7 = vsel %vm1379_vm2, %v1285_v40, %v523_v11 }
  0xdb   : > { %v544_v48 = vpop.permute.xlu1 %543  ;;  %v587_v0 = vpop.permute.xlu2 %586  ;;  %v532_v6 = vsel %vm529_vm3, %v531_v39, %v527_v7  ;;  %v516_v39 = vor.u32 1.1754944e-38, %v515_v24 }
  0xdc   : > { %v601_v3 = vmul.f32 %v587_v0, %v502_v2  ;;  %v579_v62 = vpop.permute.xlu0 %578  ;;  %v564_v34 = vmul.f32 %v1222_v55, %v544_v48  ;;  %v350_v55 = vmul.f32 %v1292_v44, %v1181_v28  ;;  %v433_v28 = vadd.f32 %v1320_v21, %v432_v51 }
  0xdd   : > { %v599_v17 = vmul.f32 %v579_v62, %v472_v10  ;;  %v441_v48 = vor.u32 1.1754944e-38, %v440_v23  ;;  %v505_v0 = vmul.f32 %v1403_v47, %v1368_v49  ;;  %v478_v10 = vadd.f32 %v1383_v57, %v477_v19 }
  0xde   : > { %v608_v33 = vadd.f32 %v601_v3, %v391_v38  ;;  %v393_v40 = vadd.f32 %v386_v41, %v350_v55  ;;  %v387_v3 = vadd.f32 %v380_v30, %v344_v1  ;;  %v385_v41 = vmul.f32 %v1295_v50, %v1248_v5 }
  0xdf   : > { %v606_v35 = vadd.f32 %v599_v17, %v389_v15  ;;  %v506_v36 = vsub.f32 1.0, %v505_v0 }
  0xe1   : > { %v613_v43 = vsel %vm301_vm9, %v564_v34, %v606_v35  ;;  %vm436_vm9 = vmor %vm434_vm4, %vm435_vm5  ;;  %v507_v18 = vmul.f32 %v1403_v47, %v506_v36  ;;  %v513_v34 = vand.u32 2147483647, %v1368_v49  ;;  %v567_v49 = vmul.f32 %v1334_v42, %v1280_v31 }
  0xe2   : > { %620 = vst [vmem:[%s1359_s29 + $0x10] sm:$0xff] %v613_v43  ;;  %v437_v2 = vsel %vm436_vm9, %v1320_v21, %v433_v28  ;;  %v562_v21 = vmul.f32 %v1266_v16, %v1231_v59  ;;  %v347_v59 = vmul.f32 %v1292_v44, %v1206_v46  ;;  %v565_v46 = vmul.f32 %v1305_v63, %v1254_v8 }
  0xe3   : > { %v552_v45 = vpop.permute.xlu1 %551  ;;  %v595_v32 = vpop.permute.xlu2 %594  ;;  %v442_v12 = vsel %vm439_vm6, %v441_v48, %v437_v2  ;;  %vm514_vm1 = vcmp.eq.f32.partialorder %v513_v34, 8.507059e+37  ;;  %v349_v8 = vmul.f32 %v1292_v44, %v1224_v56 }
  0xe4   : > { %v566_v22 = vmul.f32 %v1218_v53, %v552_v45  ;;  %v603_v54 = vmul.f32 %v595_v32, %v532_v6 }
  0xe5   : > { %v392_v26 = vadd.f32 %v385_v41, %v349_v8 }
  0xe6   : > { %v615_v60 = vsel %vm303_vm8, %v566_v22, %v608_v33  ;;  %v610_v38 = vadd.f32 %v603_v54, %v393_v40  ;;  %vm480_vm8 = vweird.f32 %v1383_v57  ;;  %v508_v33 = vadd.f32 %v1403_v47, %v507_v18 }
  0xe7   : > { %622 = vst [vmem:[%s1359_s29 + $0x20] sm:$0xff] %v615_v60 }
  0xe8   : > { %v617_v53 = vsel %vm305_vm10, %v568_v9, %v610_v38  ;;  %vm479_vm10 = vweird.f32 %v1318_v14  ;;  %v390_v14 = vadd.f32 %v383_v13, %v347_v59 }
  0xe9   : > { %624 = vst [vmem:[%s1359_s29 + $0x30] sm:$0x3f] %v617_v53  ;;  %vm481_vm14 = vmor %vm479_vm10, %vm480_vm8 }
  0xea   : > { %v482_v17 = vsel %vm481_vm14, %v1383_v57, %v478_v10 }
  0xeb   : > { %v487_v27 = vsel %vm484_vm15, %v486_v25, %v482_v17 }
  0xec   : > { %v571_v4 = vpop.permute.xlu1 %570 }
  0xed   : > { %v597_v62 = vmul.f32 %v571_v4, %v442_v12 }
  0xef   : > { %v604_v11 = vadd.f32 %v597_v62, %v387_v3 }
  0xf1   : > { %v611_v15 = vsel %vm299_vm11, %v562_v21, %v604_v11  ;;  %vm511_vm11 = vmor %vm509_vm7, %vm510_vm0 }
  0xf2   : > { %618 = vst [vmem:[%s1359_s29] sm:$0xff] %v611_v15  ;;  %v512_v43 = vsel %vm511_vm11, %v1403_v47, %v508_v33 }
  0xf3   : > { %v517_v5 = vsel %vm514_vm1, %v516_v39, %v512_v43 }
  0xf4   : > { %v583_v16 = vpop.permute.xlu1 %582 }
  0xf5   : > { %v600_v57 = vmul.f32 %v583_v16, %v487_v27 }
  0xf7   : > { %v607_v35 = vadd.f32 %v600_v57, %v390_v14 }
  0xf9   : > { %v614_v7 = vsel %vm302_vm12, %v565_v46, %v607_v35 }
  0xfa   : > { %621 = vst [vmem:[%s1359_s29 + $0x18] sm:$0xff] %v614_v7 }
  0xfc   : > { %v591_v63 = vpop.permute.xlu1 %590 }
  0xfd   : > { %v602_v50 = vmul.f32 %v591_v63, %v517_v5 }
  0xff   : > { %v609_v51 = vadd.f32 %v602_v50, %v392_v26 }
 0x101   : > { %v616_v52 = vsel %vm304_vm13, %v567_v49, %v609_v51 }
 0x102   : > { %623 = vst [vmem:[%s1359_s29 + $0x28] sm:$0xff] %v616_v52 }
 0x103   : > { %943 = shalt.err (!%p940_p0)
}
 0x104   : > { %s1008_s21 = smov 128   ;;  %s1009_s6 = smov 256  }
 0x105   : > { %s1010_s7 = smov 8  }
 0x106   : > { %770 = dma.vmem_to_hbm [thread:$0]  (%p1082_p9), %s641_s8, 896, %s643_s9, %s626_s10, %s1008_s21, %s1009_s6, %s1010_s7  }
 0x107 PF: > { %s657_s29 = sand.u32 1, %s978_s12   ;;  %p777_p1 = pnand %p759_p12, %p1089_p11 }
 0x108   : > { %s658_s22 = scalar_lea.sflag [#allocation4], %s657_s29 }
 0x109   : > { %p778_p2 = pneg %p777_p1 }
 0x10b   : > { %973 = dma.done.wait (%p778_p2), %s658_s22, 896  }
 0x10c   : > { %975 = vsyncadd (%p778_p2), %s658_s22, 4294966400  ;;  %s19_s17 = sadd.s32 1, %s998_s17   ;;  %s1516_s12 = smov %s982_s13 }
 0x10d   : > { %p16_p3 = scmp.ge.s32.totalorder %s19_s17, 4   ;;  %s1517_s13 = smov %s986_s14 }
 0x10e   : > { %s1518_s14 = smov %s1087_s26  ;;  %s1519_s15 = smov %s994_s16 }
 0x10f   : > { %s1520_s16 = smov %s1522_s20  ;;  %18 = sbr.rel (!%p16_p3) target bundleno = 6 (0x6), region = 83 }
 0x114   :  { %664 = vsyncpa [#allocation3], 1 }
 0x115   :  { %666 = vsyncpa [#allocation3 + $0x1], 1 }
 0x116   :  { %667 = vsyncpa [#allocation4], 1 }
 0x117   :  { %669 = vsyncpa [#allocation4 + $0x1], 1 }

</bundles_post_ra>
